<compile_context>
chip_gen: v5e
topology: v5e:2x2
jax: 0.10.0
libtpu: 0.0.40
codegen_flags: <defaults>
</compile_context>

<pallas_src>
from functools import partial

import jax
import jax.numpy as jnp
from jax.experimental import pallas as pl
from jax.experimental.pallas import tpu as pltpu


def _upsample_matmul_kernel(x_ref, wt_ref, b_ref, o_ref):
    """Per grid step: o = Wt @ x + b.

    x_ref : (C_in, TP)         input pixels (channels on sublane, pixels on lane)
    wt_ref: (C_out*k*k, C_in)  transposed-conv taps, rows ordered (co, kh, kw)
    b_ref : (C_out*k*k, 1)     bias replicated over the k*k taps
    o_ref : (C_out*k*k, TP)    per-pixel output patches, lane-dense
    """
    y = jnp.dot(wt_ref[...], x_ref[...], preferred_element_type=jnp.float32)
    o_ref[...] = (y + b_ref[...]).astype(o_ref.dtype)


def _pick_pixel_tile(num_pixels):
    # Largest lane-aligned tile that divides the pixel count; big tiles amortize
    # per-grid-step pipeline overhead (this kernel is memory-bound).
    for t in (2048, 1024, 512, 256, 128):
        if num_pixels % t == 0:
            return t
    return num_pixels  # small / odd spatial sizes: one full-width tile


@partial(jax.jit, static_argnames=("kernel", "stride"))
def upsample_forward(x, weight, bias, *, kernel, stride):
    """ConvTranspose2d forward.

    x: (N, C_in, H, W) f32; weight: (C_in, C_out, kH, kW) (PyTorch layout);
    bias: (C_out,).  Supports stride >= kernel (non-overlapping patches).
    """
    if stride < kernel:
        # TODO(synk): overlapping transposed conv (stride < kernel) requires a
        # scatter-add col2im with no clean Pallas tile-store equivalent.
        raise NotImplementedError("stride < kernel (overlapping taps) not supported")

    N, C_in, H, W = x.shape
    wc_in, C_out, kH, kW = weight.shape
    assert wc_in == C_in and kH == kernel and kW == kernel

    # stride > kernel: zero-extend taps to stride x stride; crop at the end.
    k = stride
    if kernel < stride:
        pad = stride - kernel
        weight = jnp.pad(weight, ((0, 0), (0, 0), (0, pad), (0, pad)))

    P = H * W
    Cokk = C_out * k * k

    # Weight (C_in, C_out, k, k) -> (C_out*k*k, C_in); bias replicated per tap.
    wt = weight.reshape(C_in, Cokk).T              # tiny, one-time
    b = jnp.repeat(bias, k * k).reshape(Cokk, 1)   # rows ordered (co, kh, kw)

    # NCHW -> (N, C_in, H*W): zero-copy reshape (channels on sublane, pixels on lane).
    x_flat = x.reshape(N, C_in, P)

    tile_p = _pick_pixel_tile(P)
    grid = (N, P // tile_p)

    flops = 2 * N * P * C_in * Cokk
    bytes_accessed = 4 * (N * C_in * P + N * Cokk * P + Cokk * C_in + Cokk)

    y = pl.pallas_call(
        _upsample_matmul_kernel,
        out_shape=jax.ShapeDtypeStruct((N, Cokk, P), x.dtype),
        grid_spec=pltpu.PrefetchScalarGridSpec(
            num_scalar_prefetch=0,
            grid=grid,
            in_specs=[
                pl.BlockSpec((None, C_in, tile_p), lambda n, t: (n, 0, t)),  # x tile
                pl.BlockSpec((Cokk, C_in), lambda n, t: (0, 0)),             # taps (resident)
                pl.BlockSpec((Cokk, 1), lambda n, t: (0, 0)),                # bias (resident)
            ],
            out_specs=pl.BlockSpec((None, Cokk, tile_p), lambda n, t: (n, 0, t)),
        ),
        compiler_params=pltpu.CompilerParams(
            dimension_semantics=("parallel", "parallel"),
        ),
        cost_estimate=pl.CostEstimate(
            flops=flops, transcendentals=0, bytes_accessed=bytes_accessed),
    )(x_flat, wt, b)

    # Depth-to-space (pixel shuffle): (N, C_out*k*k, H*W) -> (N, C_out, H*k, W*k).
    # TODO(synk): pure rearrangement (no FLOPs); left to XLA until strided
    # vector stores make it fusable into the kernel.
    y = y.reshape(N, C_out, k, k, H, W)
    y = jnp.transpose(y, (0, 1, 4, 2, 5, 3)).reshape(N, C_out, H * k, W * k)

    # Crop the zero-extended taps when stride > kernel.
    H_out = (H - 1) * stride + kernel
    W_out = (W - 1) * stride + kernel
    return y[:, :, :H_out, :W_out]


def reference_forward(x, weight, bias, *, kernel, stride):
    """Pure-JAX scatter-add reference for ConvTranspose2d (any kernel/stride)."""
    N, C_in, H, W = x.shape
    _, C_out, kH, kW = weight.shape
    H_out = (H - 1) * stride + kH
    W_out = (W - 1) * stride + kW
    out = jnp.zeros((N, C_out, H_out, W_out), x.dtype) + bias[None, :, None, None]
    for i in range(kH):
        for j in range(kW):
            contrib = jnp.einsum("nchw,cd->ndhw", x, weight[:, :, i, j])
            out = out.at[:, :, i:i + H * stride:stride, j:j + W * stride:stride].add(contrib)
    return out


if __name__ == "__main__":
    key = jax.random.PRNGKey(0)
    k_x, k_w, k_b, k_w2, k_b2 = jax.random.split(key, 5)

    # Standard learned 2x upsample: ConvTranspose2d(4, 8, kernel_size=2, stride=2)
    N, C_in, H, W = 2, 4, 16, 16
    C_out, ksz, stride = 8, 2, 2
    x = jax.random.normal(k_x, (N, C_in, H, W), jnp.float32)
    w = 0.1 * jax.random.normal(k_w, (C_in, C_out, ksz, ksz), jnp.float32)
    b = 0.1 * jax.random.normal(k_b, (C_out,), jnp.float32)

    out = jax.block_until_ready(upsample_forward(x, w, b, kernel=ksz, stride=stride))
    ref = reference_forward(x, w, b, kernel=ksz, stride=stride)
    assert out.shape == (N, C_out, (H - 1) * stride + ksz, (W - 1) * stride + ksz)
    assert jnp.allclose(out, ref, atol=1e-4, rtol=1e-4), float(jnp.max(jnp.abs(out - ref)))

    # Also exercise stride > kernel (gapped output, bias-only gap pixels).
    C_out2, ksz2, stride2 = 4, 2, 3
    w2 = 0.1 * jax.random.normal(k_w2, (C_in, C_out2, ksz2, ksz2), jnp.float32)
    b2 = 0.1 * jax.random.normal(k_b2, (C_out2,), jnp.float32)
    out2 = jax.block_until_ready(upsample_forward(x, w2, b2, kernel=ksz2, stride=stride2))
    ref2 = reference_forward(x, w2, b2, kernel=ksz2, stride=stride2)
    assert out2.shape == (N, C_out2, (H - 1) * stride2 + ksz2, (W - 1) * stride2 + ksz2)
    assert jnp.allclose(out2, ref2, atol=1e-4, rtol=1e-4), float(jnp.max(jnp.abs(out2 - ref2)))

    print("KERNEL_OK")
</pallas_src>

<mosaic_0001>
module attributes {stable_mosaic.version = 11 : i64} {
  func.func @_upsample_matmul_kernel(%arg0: i32, %arg1: i32, %arg2: memref<1x4x256xf32, #tpu.memory_space<vmem>>, %arg3: memref<32x4xf32, #tpu.memory_space<vmem>>, %arg4: memref<32x1xf32, #tpu.memory_space<vmem>>, %arg5: memref<1x32x256xf32, #tpu.memory_space<vmem>>) attributes {dimension_semantics = [#tpu.dimension_semantics<parallel>, #tpu.dimension_semantics<parallel>], iteration_bounds = array<i64: 2, 1>, scalar_prefetch = 0 : i64, scratch_operands = 0 : i64, tpu.core_type = #tpu.core_type<tc>, window_params = [{transform_indices = @transform_0, window_bounds = array<i64: 1, 4, 256>}, {pipeline_mode = #tpu.pipeline_mode<synchronous>, transform_indices = @transform_1, window_bounds = array<i64: 32, 4>}, {pipeline_mode = #tpu.pipeline_mode<synchronous>, transform_indices = @transform_2, window_bounds = array<i64: 32, 1>}, {transform_indices = @transform_3, window_bounds = array<i64: 1, 32, 256>}]} {
    %c0 = arith.constant 0 : index
    %c0_0 = arith.constant 0 : index
    %0 = vector.load %arg3[%c0, %c0_0] : memref<32x4xf32, #tpu.memory_space<vmem>>, vector<32x4xf32>
    %c0_1 = arith.constant 0 : index
    %c0_2 = arith.constant 0 : index
    %c0_3 = arith.constant 0 : index
    %1 = vector.load %arg2[%c0_1, %c0_2, %c0_3] : memref<1x4x256xf32, #tpu.memory_space<vmem>>, vector<1x4x256xf32>
    %2 = vector.shape_cast %1 : vector<1x4x256xf32> to vector<4x256xf32>
    %cst = arith.constant dense<0.000000e+00> : vector<32x256xf32>
    %3 = tpu.matmul %0, %2, %cst {dimension_numbers = #tpu.dot_dimension_numbers<[1], [0], [0], [1], [0, 0, 1, 1], [], []>} : vector<32x4xf32>, vector<4x256xf32>, vector<32x256xf32> -> vector<32x256xf32>
    %c0_4 = arith.constant 0 : index
    %c0_5 = arith.constant 0 : index
    %4 = vector.load %arg4[%c0_4, %c0_5] : memref<32x1xf32, #tpu.memory_space<vmem>>, vector<32x1xf32>
    %5 = vector.broadcast %4 : vector<32x1xf32> to vector<32x256xf32>
    %6 = arith.addf %3, %5 : vector<32x256xf32>
    %c0_6 = arith.constant 0 : index
    %c0_7 = arith.constant 0 : index
    %c0_8 = arith.constant 0 : index
    %7 = vector.load %arg5[%c0_6, %c0_7, %c0_8] : memref<1x32x256xf32, #tpu.memory_space<vmem>>, vector<1x32x256xf32>
    %8 = vector.shape_cast %7 : vector<1x32x256xf32> to vector<32x256xf32>
    %9 = vector.shape_cast %6 : vector<32x256xf32> to vector<1x32x256xf32>
    tpu.vector_store %arg5[%c0_6, %c0_7, %c0_8], %9 {strides = array<i32>} : memref<1x32x256xf32, #tpu.memory_space<vmem>>, vector<1x32x256xf32>,
    return
  }
  func.func @transform_0(%arg0: i32, %arg1: i32) -> (i32, i32, i32) {
    %c0_i32 = arith.constant 0 : i32
    %c0_i32_0 = arith.constant 0 : i32
    return %arg0, %c0_i32, %arg1 : i32, i32, i32
  }
  func.func @transform_1(%arg0: i32, %arg1: i32) -> (i32, i32) {
    %c0_i32 = arith.constant 0 : i32
    %c0_i32_0 = arith.constant 0 : i32
    %c0_i32_1 = arith.constant 0 : i32
    return %c0_i32, %c0_i32_0 : i32, i32
  }
  func.func @transform_2(%arg0: i32, %arg1: i32) -> (i32, i32) {
    %c0_i32 = arith.constant 0 : i32
    %c0_i32_0 = arith.constant 0 : i32
    %c0_i32_1 = arith.constant 0 : i32
    return %c0_i32, %c0_i32_0 : i32, i32
  }
  func.func @transform_3(%arg0: i32, %arg1: i32) -> (i32, i32, i32) {
    %c0_i32 = arith.constant 0 : i32
    %c0_i32_0 = arith.constant 0 : i32
    return %arg0, %c0_i32, %arg1 : i32, i32, i32
  }
}

</mosaic_0001>

<bundles_post_ra>
// kernel: upsample_forward.1
= control target key start
LH: loop header
LB: loop body
LE: loop exit
PB: predicated region body
PF: predicated region fallthrough
CT: control target
= control target key end

     0   :  { %s511_s12 = smov 0   ;;  %s513_s13 = smov 0   ;;  %s580_s0 = inlined_call_operand.vmem [shape: f32[2,4,256], index: 0, kind: input, shape index: {}]   ;;  %s581_s1 = inlined_call_operand.vmem [shape: f32[32,4], index: 1, kind: input, shape index: {}]   ;;  %s582_s2 = inlined_call_operand.vmem [shape: f32[32,1], index: 2, kind: input, shape index: {}]   ;;  %s583_s3 = inlined_call_operand.vmem [shape: f32[2,32,256], index: 3, kind: output, shape index: {}]  }
   0x1   :  { %s515_s14 = smov 0  }
   0x2 LB: > { %s25_s15 = sadd.s32 1, %s484_s13  ;;  %p418_p0 = scmp.ge.s32.totalorder %s488_s14, 1  ;;  %s488_s14 = sphi %s515_s14, %s13_s14   ;;  %s484_s13 = sphi %s513_s13, %s585_s13   ;;  %s480_s12 = sphi %s511_s12, %s584_s12  }
   0x3   : > { %p27_p1 = scmp.ge.s32.totalorder %s25_s15, 2  ;;  %p158_p2 = scmp.lt.s32.totalorder %s488_s14, 3 }
   0x5   : > { %s587_s15 = smov (%p27_p1, %s25_s15), 0  ;;  %p159_p3 = pnand %p418_p0, %p158_p2 }
   0x6   : > { %p191_p4 = scmp.lt.s32.totalorder (!%p159_p3), %s480_s12, 1 }
   0x7   : > { %162 = sbr.rel (%p159_p3) target bundleno = 170 (0xaa), region = 32 }
   0xc   : > { %v490_v0 = vmov 0   ;;  %v217_v1 = vld [vmem:[%s582_s2 + $0x10] sm:$0xff]  ;;  %s589_s12 = smov (!%p191_p4, %s480_s12), 1  ;;  %v215_v2 = vld [vmem:[%s582_s2] sm:$0xff]  ;;  %v218_v4 = vld [vmem:[%s582_s2 + $0x18] sm:$0xff]  ;;  %vm256_vm0 = vcmask 1043456  }
   0xd   : > { %465 = vset.pattern.permute.xlu1 %v490_v0  ;;  %464 = vset.pattern.permute.xlu0 %v490_v0  ;;  %s435_s20 = sshll.u32 %s589_s12, 3  ;;  %v216_v5 = vld [vmem:[%s582_s2 + $0x8] sm:$0xff]  ;;  %v210_v6 = vld [vmem:[%s581_s1] sm:$0xff]  ;;  %vm243_vm1 = vcmask 31744   ;;  %v212_v7 = vld [vmem:[%s581_s1 + $0x10] sm:$0xff]  ;;  %s436_s9 = sshll.u32 %s589_s12, 6 }
   0xe   : > { %231 = vperm.xlu1 %465, %v217_v1   ;;  %221 = vperm.xlu0 %464, %v215_v2   ;;  %s198_s23 = scalar_lea.vmem %s580_s0, %s435_s20  ;;  %v211_v10 = vld [vmem:[%s581_s1 + $0x8] sm:$0xff]  ;;  %v213_v11 = vld [vmem:[%s581_s1 + $0x18] sm:$0xff]  ;;  %s208_s16 = scalar_lea.vmem %s583_s3, %s436_s9 }
   0xf   : > { %v214_v3 = vld [vmem:[%s198_s23] sm:$0xff] }
  0x10   : > { %240 = vst [vmem:[#allocation1] ss:$2 sm:$0xff] %v214_v3 }
  0x16   : > { %236 = vperm.xlu1 %465, %v218_v4   ;;  %226 = vperm.xlu0 %464, %v216_v5  }
  0x17   : > { %v241_v8 = vld.sshfl [vmem:[#allocation1] sm:$0xff pattern:$0x75316420]  ;;  %v242_v9 = vld.sshfl [vmem:[#allocation1 + $0x8] sm:$0xff pattern:$0x75316420] }
  0x18   : > { %423 = vmatpush.msk.msra.mxu0 %vm256_vm0, %v241_v8  ;;  %437 = vmatpush.msk.msra.mxu2 %vm256_vm0, %v241_v8 }
  0x19   : > { %428 = vmatpush.msk.msra.mxu1 %vm256_vm0, %v242_v9  ;;  %438 = vmatpush.msk.msra.mxu3 %vm256_vm0, %v242_v9 }
  0x1a   : > { %424 = vmatmul.msk.f32.vlgmr.msra.gmra.mxu0 %vm243_vm1, %v210_v6  ;;  %426 = vmatmul.msk.f32.vlgmr.msra.gmra.mxu2 %vm243_vm1, %v212_v7 }
  0x1b   : > { %429 = vmatmul.msk.f32.vlgmr.msra.gmra.mxu1 %vm243_vm1, %v210_v6  ;;  %431 = vmatmul.msk.f32.vlgmr.msra.gmra.mxu3 %vm243_vm1, %v212_v7 }
  0x22   : > { %425 = vmatmul.msk.f32.gmra.mxu0 %vm243_vm1, %v211_v10  ;;  %427 = vmatmul.msk.f32.gmra.mxu2 %vm243_vm1, %v213_v11 }
  0x23   : > { %430 = vmatmul.msk.f32.gmra.mxu1 %vm243_vm1, %v211_v10  ;;  %432 = vmatmul.msk.f32.gmra.mxu3 %vm243_vm1, %v213_v11 }
  0x80   : > { %v222_v12 = vpop.permute.xlu0 %221  ;;  %v232_v17 = vpop.permute.xlu1 %231 }
  0x88   : > { %v227_v21 = vpop.permute.xlu0 %226  ;;  %v237_v27 = vpop.permute.xlu1 %236 }
  0x97   : > { %v278_v13 = vpop.f32.mrf.mxu0 }
  0x98   : > { %v279_v14 = vadd.f32 %v278_v13, %v222_v12  ;;  %v307_v15 = vpop.f32.mrf.mxu1 }
  0x99   : > { %v308_v16 = vadd.f32 %v307_v15, %v222_v12 }
  0x9a   : > { %319 = vst [vmem:[%s208_s16] sm:$0xff] %v279_v14 }
  0x9b   : > { %320 = vst [vmem:[%s208_s16 + $0x8] sm:$0xff] %v308_v16 }
  0x9d   : > { %v284_v18 = vpop.f32.mrf.mxu2 }
  0x9e   : > { %v285_v19 = vadd.f32 %v284_v18, %v232_v17  ;;  %v313_v20 = vpop.f32.mrf.mxu3 }
  0x9f   : > { %v314_v22 = vadd.f32 %v313_v20, %v232_v17  ;;  %v281_v23 = vpop.f32.mrf.mxu0 }
  0xa0   : > { %323 = vst [vmem:[%s208_s16 + $0x20] sm:$0xff] %v285_v19  ;;  %v282_v24 = vadd.f32 %v281_v23, %v227_v21  ;;  %v310_v25 = vpop.f32.mrf.mxu1 }
  0xa1   : > { %324 = vst [vmem:[%s208_s16 + $0x28] sm:$0xff] %v314_v22  ;;  %v311_v26 = vadd.f32 %v310_v25, %v227_v21 }
  0xa2   : > { %321 = vst [vmem:[%s208_s16 + $0x10] sm:$0xff] %v282_v24 }
  0xa3   : > { %322 = vst [vmem:[%s208_s16 + $0x18] sm:$0xff] %v311_v26 }
  0xa5   : > { %v287_v28 = vpop.f32.mrf.mxu2 }
  0xa6   : > { %v288_v29 = vadd.f32 %v287_v28, %v237_v27  ;;  %v316_v30 = vpop.f32.mrf.mxu3 }
  0xa7   : > { %v317_v31 = vadd.f32 %v316_v30, %v237_v27 }
  0xa8   : > { %325 = vst [vmem:[%s208_s16 + $0x30] sm:$0xff] %v288_v29 }
  0xa9   : > { %326 = vst [vmem:[%s208_s16 + $0x38] sm:$0xff] %v317_v31 }
  0xaa PF: > { %s13_s14 = sadd.s32 1, %s488_s14   ;;  %s584_s12 = smov %s484_s13 }
  0xab   : > { %p10_p5 = scmp.ge.s32.totalorder %s13_s14, 4   ;;  %s585_s13 = smov %s587_s15 }
  0xad   :  { %12 = sbr.rel (!%p10_p5) target bundleno = 2 (0x2), region = 62 }

</bundles_post_ra>
